<compile_context>
chip_gen: v7x
topology: tpu7x:2x2x1
jax: 0.10.0
libtpu: 0.0.40
codegen_flags: <defaults>
</compile_context>

<pallas_src>
import functools
import math

import jax
import jax.numpy as jnp
from jax.experimental import pallas as pl
from jax.experimental.pallas import tpu as pltpu

# DilConv(C_in=4, C_out=8, kernel_size=3, stride=1, padding=2, dilation=2)
C_IN, C_OUT, K, STRIDE, PAD, DIL = 4, 8, 3, 1, 2, 2
EPS = 1e-5


def _shift_zero_fill(x, d, l):
    """tap[:, p] = x[:, p + d] with zeros outside [0, l). `d` is a static int."""
    if d == 0:
        return x
    rows = x.shape[0]
    if l % 128 == 0:
        # Lane-aligned slab: rotate on the (otherwise idle) XLU slot and mask
        # the wrapped lanes instead of misaligned offset slices.
        rolled = pltpu.roll(x, shift=(-d) % l, axis=1)
        pos = jax.lax.broadcasted_iota(jnp.int32, (1, l), 1)
        mask = (pos < l - d) if d > 0 else (pos >= -d)
        return jnp.where(mask, rolled, 0.0)
    # Small / non-128-aligned L (e.g. the shipped L=16): zero-fill shift via a
    # static slice + concat; the injected zeros are exactly the conv padding.
    zeros = jnp.zeros((rows, abs(d)), x.dtype)
    if d > 0:
        return jnp.concatenate([x[:, d:], zeros], axis=1)
    return jnp.concatenate([zeros, x[:, : l + d]], axis=1)


def _relu_dw_pw(x_ref, wdw_ref, wpw_ref, *, c_in, c_out, k, dilation, pad, l):
    """ReLU -> depthwise dilated conv -> pointwise 1x1 conv for one sample."""
    xb = jnp.maximum(x_ref[0].astype(jnp.float32), 0.0)        # (c_in, l)
    wdw = wdw_ref[...]                                          # (c_in, k)
    wpw = wpw_ref[...]                                          # (c_out, c_in)

    # Depthwise dilated conv: K static zero-fill shifted taps (d = kk*dil - pad).
    acc = jnp.zeros((c_in, l), jnp.float32)
    for kk in range(k):                                         # K is small & static
        d = kk * dilation - pad
        acc = acc + wdw[:, kk:kk + 1] * _shift_zero_fill(xb, d, l)

    # Pointwise 1x1 conv as a C_in-term VPU outer-product accumulation
    # (MXU would be <1% utilized at 4x8 channels; switch to jnp.dot if the
    # module is ever instantiated with C_in/C_out >= ~64).
    y = jnp.zeros((c_out, l), jnp.float32)
    for c in range(c_in):
        y = y + wpw[:, c:c + 1] * acc[c:c + 1, :]
    return y


def dilconv_stats_kernel(x_ref, wdw_ref, wpw_ref, mean_ref, m2_ref,
                         *, c_in, c_out, k, dilation, pad, l):
    # Per-sample, per-channel partial BN statistics: mean and M2 = sum((y-mean)^2).
    y = _relu_dw_pw(x_ref, wdw_ref, wpw_ref, c_in=c_in, c_out=c_out, k=k,
                    dilation=dilation, pad=pad, l=l)
    mean = jnp.sum(y, axis=1, keepdims=True) * (1.0 / l)        # (c_out, 1)
    centered = y - mean
    m2 = jnp.sum(centered * centered, axis=1, keepdims=True)    # (c_out, 1)
    mean_ref[0] = mean
    m2_ref[0] = m2


def dilconv_norm_kernel(x_ref, wdw_ref, wpw_ref, scale_ref, shift_ref, o_ref,
                        *, c_in, c_out, k, dilation, pad, l):
    # Recompute the cheap conv and apply the precomputed BN scale/shift.
    y = _relu_dw_pw(x_ref, wdw_ref, wpw_ref, c_in=c_in, c_out=c_out, k=k,
                    dilation=dilation, pad=pad, l=l)
    o_ref[0] = (y * scale_ref[...] + shift_ref[...]).astype(o_ref.dtype)


@jax.jit
def dilconv_forward(x, w_dw, w_pw, gamma, beta):
    n, c_in, l = x.shape
    c_out = w_pw.shape[0]
    k = w_dw.shape[1]
    l_out = (l + 2 * PAD - DIL * (k - 1) - 1) // STRIDE + 1
    # Per-sample shift scheme relies on the conv being "same" (stride 1, l_out == l).
    assert STRIDE == 1 and l_out == l

    wdw = w_dw.astype(jnp.float32)
    wpw = w_pw.astype(jnp.float32)
    shapes = dict(c_in=c_in, c_out=c_out, k=k, dilation=DIL, pad=PAD, l=l)

    x_spec = pl.BlockSpec((1, c_in, l), lambda i: (i, 0, 0))
    w_specs = [pl.BlockSpec((c_in, k), lambda i: (0, 0)),
               pl.BlockSpec((c_out, c_in), lambda i: (0, 0))]
    stat_spec = pl.BlockSpec((1, c_out, 1), lambda i: (i, 0, 0))
    cparams = pltpu.CompilerParams(
        dimension_semantics=("parallel",),        # shards over 2 TCs on v7x
        vmem_limit_bytes=32 * 1024 * 1024)        # explicit; per-sample blocks are tiny

    conv_flops = 2 * l * (c_in * k + c_in * c_out)

    # ---- Pass 1: per-sample per-channel BN partials (mean, M2). ----
    mean_n, m2_n = pl.pallas_call(
        functools.partial(dilconv_stats_kernel, **shapes),
        out_shape=(jax.ShapeDtypeStruct((n, c_out, 1), jnp.float32),
                   jax.ShapeDtypeStruct((n, c_out, 1), jnp.float32)),
        grid=(n,),
        in_specs=[x_spec] + w_specs,
        out_specs=(stat_spec, stat_spec),
        compiler_params=cparams,
        cost_estimate=pl.CostEstimate(
            flops=n * (conv_flops + 4 * c_out * l), transcendentals=0,
            bytes_accessed=4 * (n * c_in * l + c_in * k + c_out * c_in
                                + 2 * n * c_out)),
    )(x, wdw, wpw)

    # Exact grouped (Chan) combination of the per-sample stats (tiny JAX ops);
    # avoids the E[y^2] - mean^2 cancellation of a single-pass formula.
    mean_n = mean_n[..., 0]                       # (n, c_out)
    m2_n = m2_n[..., 0]                           # (n, c_out)
    mean = jnp.mean(mean_n, axis=0)               # (c_out,), equal counts per sample
    m2 = jnp.sum(m2_n, axis=0) + l * jnp.sum((mean_n - mean[None, :]) ** 2, axis=0)
    var = m2 / (n * l)                            # biased (training-mode BN forward)
    inv_std = jax.lax.rsqrt(var + EPS)
    scale_flat = gamma.astype(jnp.float32) * inv_std
    shift_flat = beta.astype(jnp.float32) - mean * scale_flat
    scale = scale_flat.reshape(c_out, 1)
    shift = shift_flat.reshape(c_out, 1)

    # ---- Pass 2: recompute conv + normalize, write (N, C_out, L) directly. ----
    # TODO(synk): for very long L, add an L-tile grid axis with a PAD-wide halo
    # (overlapping index_map) and optionally stream x/y as bf16 to halve HBM bytes;
    # for tiny L (e.g. 16) batching several DilConv instances into one call would
    # widen the lane axis past 128 and amortize the ~0.35 us per-step overhead.
    y = pl.pallas_call(
        functools.partial(dilconv_norm_kernel, **shapes),
        out_shape=jax.ShapeDtypeStruct((n, c_out, l), x.dtype),
        grid=(n,),
        in_specs=[x_spec] + w_specs + [
            pl.BlockSpec((c_out, 1), lambda i: (0, 0)),
            pl.BlockSpec((c_out, 1), lambda i: (0, 0)),
        ],
        out_specs=pl.BlockSpec((1, c_out, l), lambda i: (i, 0, 0)),
        compiler_params=cparams,
        cost_estimate=pl.CostEstimate(
            flops=n * (conv_flops + 2 * c_out * l), transcendentals=0,
            bytes_accessed=4 * (n * c_in * l + c_in * k + c_out * c_in
                                + 2 * c_out + n * c_out * l)),
    )(x, wdw, wpw, scale, shift)
    return y


def reference(x, w_dw, w_pw, gamma, beta):
    # Pure-JAX reference of the PyTorch forward (training-mode BN).
    xr = jnp.maximum(x, 0.0)
    dw = jax.lax.conv_general_dilated(
        xr, w_dw.reshape(C_IN, 1, K),
        window_strides=(STRIDE,), padding=((PAD, PAD),),
        rhs_dilation=(DIL,), feature_group_count=C_IN,
        dimension_numbers=("NCH", "OIH", "NCH"))
    y = jnp.einsum("oc,ncl->nol", w_pw, dw,
                   precision=jax.lax.Precision.HIGHEST)
    mean = y.mean(axis=(0, 2), keepdims=True)
    var = ((y - mean) ** 2).mean(axis=(0, 2), keepdims=True)
    yn = (y - mean) / jnp.sqrt(var + EPS)
    return yn * gamma[None, :, None] + beta[None, :, None]


if __name__ == "__main__":
    key = jax.random.PRNGKey(0)
    k1, k2, k3 = jax.random.split(key, 3)

    N, L = 2, 16
    x = jax.random.normal(k1, (N, C_IN, L), jnp.float32)
    # Deterministic synthetic parameters (shapes from the module's __init__):
    # depthwise Conv1d weight (C_in, 1, K) -> stored as (C_in, K)
    w_dw = jax.random.normal(k2, (C_IN, K), jnp.float32) * (1.0 / math.sqrt(K))
    # pointwise Conv1d weight (C_out, C_in, 1) -> stored as (C_out, C_in)
    w_pw = jax.random.normal(k3, (C_OUT, C_IN), jnp.float32) * (1.0 / math.sqrt(C_IN))
    # BatchNorm1d affine params at init
    gamma = jnp.ones((C_OUT,), jnp.float32)
    beta = jnp.zeros((C_OUT,), jnp.float32)

    out = dilconv_forward(x, w_dw, w_pw, gamma, beta)
    jax.block_until_ready(out)

    ref = reference(x, w_dw, w_pw, gamma, beta)
    assert out.shape == ref.shape == (N, C_OUT, L)
    err = float(jnp.max(jnp.abs(out - ref)))
    assert err < 1e-4, err

    print("KERNEL_OK")
</pallas_src>

<mosaic_0001>
module attributes {stable_mosaic.version = 11 : i64} {
  func.func @dilconv_stats_kernel(%arg0: i32, %arg1: memref<1x4x16xf32, #tpu.memory_space<vmem>>, %arg2: memref<4x3xf32, #tpu.memory_space<vmem>>, %arg3: memref<8x4xf32, #tpu.memory_space<vmem>>, %arg4: memref<1x8x1xf32, #tpu.memory_space<vmem>>, %arg5: memref<1x8x1xf32, #tpu.memory_space<vmem>>) attributes {dimension_semantics = [#tpu.dimension_semantics<parallel>], iteration_bounds = array<i64: 2>, scalar_prefetch = 0 : i64, scratch_operands = 0 : i64, tpu.core_type = #tpu.core_type<tc>, window_params = [{transform_indices = @transform_0, window_bounds = array<i64: 1, 4, 16>}, {pipeline_mode = #tpu.pipeline_mode<synchronous>, transform_indices = @transform_1, window_bounds = array<i64: 4, 3>}, {pipeline_mode = #tpu.pipeline_mode<synchronous>, transform_indices = @transform_2, window_bounds = array<i64: 8, 4>}, {transform_indices = @transform_3, window_bounds = array<i64: 1, 8, 1>}, {transform_indices = @transform_4, window_bounds = array<i64: 1, 8, 1>}]} {
    %c0 = arith.constant 0 : index
    %c0_0 = arith.constant 0 : index
    %c0_1 = arith.constant 0 : index
    %0 = vector.load %arg1[%c0, %c0_0, %c0_1] : memref<1x4x16xf32, #tpu.memory_space<vmem>>, vector<1x4x16xf32>
    %1 = vector.shape_cast %0 : vector<1x4x16xf32> to vector<4x16xf32>
    %cst = arith.constant 0.000000e+00 : f32
    %2 = vector.broadcast %cst : f32 to vector<4x16xf32>
    %3 = arith.maximumf %1, %2 : vector<4x16xf32>
    %c0_2 = arith.constant 0 : index
    %c0_3 = arith.constant 0 : index
    %4 = vector.load %arg2[%c0_2, %c0_3] : memref<4x3xf32, #tpu.memory_space<vmem>>, vector<4x3xf32>
    %c0_4 = arith.constant 0 : index
    %c0_5 = arith.constant 0 : index
    %5 = vector.load %arg3[%c0_4, %c0_5] : memref<8x4xf32, #tpu.memory_space<vmem>>, vector<8x4xf32>
    %cst_6 = arith.constant 0.000000e+00 : f32
    %6 = vector.broadcast %cst_6 : f32 to vector<4x16xf32>
    %7 = vector.extract_strided_slice %4 {offsets = [0, 0], sizes = [4, 1], strides = [1, 1]} : vector<4x3xf32> to vector<4x1xf32>
    %cst_7 = arith.constant 0.000000e+00 : f32
    %8 = vector.broadcast %cst_7 : f32 to vector<4x2xf32>
    %9 = vector.extract_strided_slice %3 {offsets = [0, 0], sizes = [4, 14], strides = [1, 1]} : vector<4x16xf32> to vector<4x14xf32>
    %10 = tpu.concatenate %8, %9 in 1 : vector<4x2xf32>, vector<4x14xf32> -> vector<4x16xf32>
    %11 = vector.broadcast %7 : vector<4x1xf32> to vector<4x16xf32>
    %12 = arith.mulf %11, %10 : vector<4x16xf32>
    %13 = arith.addf %6, %12 : vector<4x16xf32>
    %14 = vector.extract_strided_slice %4 {offsets = [0, 1], sizes = [4, 1], strides = [1, 1]} : vector<4x3xf32> to vector<4x1xf32>
    %15 = vector.broadcast %14 : vector<4x1xf32> to vector<4x16xf32>
    %16 = arith.mulf %15, %3 : vector<4x16xf32>
    %17 = arith.addf %13, %16 : vector<4x16xf32>
    %18 = vector.extract_strided_slice %4 {offsets = [0, 2], sizes = [4, 1], strides = [1, 1]} : vector<4x3xf32> to vector<4x1xf32>
    %cst_8 = arith.constant 0.000000e+00 : f32
    %19 = vector.broadcast %cst_8 : f32 to vector<4x2xf32>
    %20 = vector.extract_strided_slice %3 {offsets = [0, 2], sizes = [4, 14], strides = [1, 1]} : vector<4x16xf32> to vector<4x14xf32>
    %21 = tpu.concatenate %20, %19 in 1 : vector<4x14xf32>, vector<4x2xf32> -> vector<4x16xf32>
    %22 = vector.broadcast %18 : vector<4x1xf32> to vector<4x16xf32>
    %23 = arith.mulf %22, %21 : vector<4x16xf32>
    %24 = arith.addf %17, %23 : vector<4x16xf32>
    %cst_9 = arith.constant 0.000000e+00 : f32
    %25 = vector.broadcast %cst_9 : f32 to vector<8x16xf32>
    %26 = vector.extract_strided_slice %5 {offsets = [0, 0], sizes = [8, 1], strides = [1, 1]} : vector<8x4xf32> to vector<8x1xf32>
    %27 = vector.extract_strided_slice %24 {offsets = [0, 0], sizes = [1, 16], strides = [1, 1]} : vector<4x16xf32> to vector<1x16xf32>
    %28 = vector.broadcast %26 : vector<8x1xf32> to vector<8x16xf32>
    %29 = vector.broadcast %27 : vector<1x16xf32> to vector<8x16xf32>
    %30 = arith.mulf %28, %29 : vector<8x16xf32>
    %31 = arith.addf %25, %30 : vector<8x16xf32>
    %32 = vector.extract_strided_slice %5 {offsets = [0, 1], sizes = [8, 1], strides = [1, 1]} : vector<8x4xf32> to vector<8x1xf32>
    %33 = vector.extract_strided_slice %24 {offsets = [1, 0], sizes = [1, 16], strides = [1, 1]} : vector<4x16xf32> to vector<1x16xf32>
    %34 = vector.broadcast %32 : vector<8x1xf32> to vector<8x16xf32>
    %35 = vector.broadcast %33 : vector<1x16xf32> to vector<8x16xf32>
    %36 = arith.mulf %34, %35 : vector<8x16xf32>
    %37 = arith.addf %31, %36 : vector<8x16xf32>
    %38 = vector.extract_strided_slice %5 {offsets = [0, 2], sizes = [8, 1], strides = [1, 1]} : vector<8x4xf32> to vector<8x1xf32>
    %39 = vector.extract_strided_slice %24 {offsets = [2, 0], sizes = [1, 16], strides = [1, 1]} : vector<4x16xf32> to vector<1x16xf32>
    %40 = vector.broadcast %38 : vector<8x1xf32> to vector<8x16xf32>
    %41 = vector.broadcast %39 : vector<1x16xf32> to vector<8x16xf32>
    %42 = arith.mulf %40, %41 : vector<8x16xf32>
    %43 = arith.addf %37, %42 : vector<8x16xf32>
    %44 = vector.extract_strided_slice %5 {offsets = [0, 3], sizes = [8, 1], strides = [1, 1]} : vector<8x4xf32> to vector<8x1xf32>
    %45 = vector.extract_strided_slice %24 {offsets = [3, 0], sizes = [1, 16], strides = [1, 1]} : vector<4x16xf32> to vector<1x16xf32>
    %46 = vector.broadcast %44 : vector<8x1xf32> to vector<8x16xf32>
    %47 = vector.broadcast %45 : vector<1x16xf32> to vector<8x16xf32>
    %48 = arith.mulf %46, %47 : vector<8x16xf32>
    %49 = arith.addf %43, %48 : vector<8x16xf32>
    %cst_10 = arith.constant dense<0.000000e+00> : vector<8xf32>
    %50 = vector.multi_reduction <add>, %49, %cst_10 [1] : vector<8x16xf32> to vector<8xf32>
    %51 = vector.shape_cast %50 : vector<8xf32> to vector<8x1xf32>
    %cst_11 = arith.constant 6.250000e-02 : f32
    %52 = vector.broadcast %cst_11 : f32 to vector<8x1xf32>
    %53 = arith.mulf %51, %52 : vector<8x1xf32>
    %54 = vector.broadcast %53 : vector<8x1xf32> to vector<8x16xf32>
    %55 = arith.subf %49, %54 : vector<8x16xf32>
    %56 = arith.mulf %55, %55 : vector<8x16xf32>
    %cst_12 = arith.constant dense<0.000000e+00> : vector<8xf32>
    %57 = vector.multi_reduction <add>, %56, %cst_12 [1] : vector<8x16xf32> to vector<8xf32>
    %58 = vector.shape_cast %57 : vector<8xf32> to vector<8x1xf32>
    %c0_13 = arith.constant 0 : index
    %c0_14 = arith.constant 0 : index
    %c0_15 = arith.constant 0 : index
    %59 = vector.load %arg4[%c0_13, %c0_14, %c0_15] : memref<1x8x1xf32, #tpu.memory_space<vmem>>, vector<1x8x1xf32>
    %60 = vector.shape_cast %59 : vector<1x8x1xf32> to vector<8x1xf32>
    %61 = vector.shape_cast %53 : vector<8x1xf32> to vector<1x8x1xf32>
    tpu.vector_store %arg4[%c0_13, %c0_14, %c0_15], %61 {strides = array<i32>} : memref<1x8x1xf32, #tpu.memory_space<vmem>>, vector<1x8x1xf32>,
    %c0_16 = arith.constant 0 : index
    %c0_17 = arith.constant 0 : index
    %c0_18 = arith.constant 0 : index
    %62 = vector.load %arg5[%c0_16, %c0_17, %c0_18] : memref<1x8x1xf32, #tpu.memory_space<vmem>>, vector<1x8x1xf32>
    %63 = vector.shape_cast %62 : vector<1x8x1xf32> to vector<8x1xf32>
    %64 = vector.shape_cast %58 : vector<8x1xf32> to vector<1x8x1xf32>
    tpu.vector_store %arg5[%c0_16, %c0_17, %c0_18], %64 {strides = array<i32>} : memref<1x8x1xf32, #tpu.memory_space<vmem>>, vector<1x8x1xf32>,
    return
  }
  func.func @transform_0(%arg0: i32) -> (i32, i32, i32) {
    %c0_i32 = arith.constant 0 : i32
    %c0_i32_0 = arith.constant 0 : i32
    %c0_i32_1 = arith.constant 0 : i32
    return %arg0, %c0_i32, %c0_i32_0 : i32, i32, i32
  }
  func.func @transform_1(%arg0: i32) -> (i32, i32) {
    %c0_i32 = arith.constant 0 : i32
    %c0_i32_0 = arith.constant 0 : i32
    %c0_i32_1 = arith.constant 0 : i32
    return %c0_i32, %c0_i32_0 : i32, i32
  }
  func.func @transform_2(%arg0: i32) -> (i32, i32) {
    %c0_i32 = arith.constant 0 : i32
    %c0_i32_0 = arith.constant 0 : i32
    %c0_i32_1 = arith.constant 0 : i32
    return %c0_i32, %c0_i32_0 : i32, i32
  }
  func.func @transform_3(%arg0: i32) -> (i32, i32, i32) {
    %c0_i32 = arith.constant 0 : i32
    %c0_i32_0 = arith.constant 0 : i32
    %c0_i32_1 = arith.constant 0 : i32
    return %arg0, %c0_i32, %c0_i32_0 : i32, i32, i32
  }
  func.func @transform_4(%arg0: i32) -> (i32, i32, i32) {
    %c0_i32 = arith.constant 0 : i32
    %c0_i32_0 = arith.constant 0 : i32
    %c0_i32_1 = arith.constant 0 : i32
    return %arg0, %c0_i32, %c0_i32_0 : i32, i32, i32
  }
}

module attributes {stable_mosaic.version = 11 : i64} {
  func.func @dilconv_norm_kernel(%arg0: i32, %arg1: memref<1x4x16xf32, #tpu.memory_space<vmem>>, %arg2: memref<4x3xf32, #tpu.memory_space<vmem>>, %arg3: memref<8x4xf32, #tpu.memory_space<vmem>>, %arg4: memref<8x1xf32, #tpu.memory_space<vmem>>, %arg5: memref<8x1xf32, #tpu.memory_space<vmem>>, %arg6: memref<1x8x16xf32, #tpu.memory_space<vmem>>) attributes {dimension_semantics = [#tpu.dimension_semantics<parallel>], iteration_bounds = array<i64: 2>, scalar_prefetch = 0 : i64, scratch_operands = 0 : i64, tpu.core_type = #tpu.core_type<tc>, window_params = [{transform_indices = @transform_0, window_bounds = array<i64: 1, 4, 16>}, {pipeline_mode = #tpu.pipeline_mode<synchronous>, transform_indices = @transform_1, window_bounds = array<i64: 4, 3>}, {pipeline_mode = #tpu.pipeline_mode<synchronous>, transform_indices = @transform_2, window_bounds = array<i64: 8, 4>}, {pipeline_mode = #tpu.pipeline_mode<synchronous>, transform_indices = @transform_3, window_bounds = array<i64: 8, 1>}, {pipeline_mode = #tpu.pipeline_mode<synchronous>, transform_indices = @transform_4, window_bounds = array<i64: 8, 1>}, {transform_indices = @transform_5, window_bounds = array<i64: 1, 8, 16>}]} {
    %c0 = arith.constant 0 : index
    %c0_0 = arith.constant 0 : index
    %c0_1 = arith.constant 0 : index
    %0 = vector.load %arg1[%c0, %c0_0, %c0_1] : memref<1x4x16xf32, #tpu.memory_space<vmem>>, vector<1x4x16xf32>
    %1 = vector.shape_cast %0 : vector<1x4x16xf32> to vector<4x16xf32>
    %cst = arith.constant 0.000000e+00 : f32
    %2 = vector.broadcast %cst : f32 to vector<4x16xf32>
    %3 = arith.maximumf %1, %2 : vector<4x16xf32>
    %c0_2 = arith.constant 0 : index
    %c0_3 = arith.constant 0 : index
    %4 = vector.load %arg2[%c0_2, %c0_3] : memref<4x3xf32, #tpu.memory_space<vmem>>, vector<4x3xf32>
    %c0_4 = arith.constant 0 : index
    %c0_5 = arith.constant 0 : index
    %5 = vector.load %arg3[%c0_4, %c0_5] : memref<8x4xf32, #tpu.memory_space<vmem>>, vector<8x4xf32>
    %cst_6 = arith.constant 0.000000e+00 : f32
    %6 = vector.broadcast %cst_6 : f32 to vector<4x16xf32>
    %7 = vector.extract_strided_slice %4 {offsets = [0, 0], sizes = [4, 1], strides = [1, 1]} : vector<4x3xf32> to vector<4x1xf32>
    %cst_7 = arith.constant 0.000000e+00 : f32
    %8 = vector.broadcast %cst_7 : f32 to vector<4x2xf32>
    %9 = vector.extract_strided_slice %3 {offsets = [0, 0], sizes = [4, 14], strides = [1, 1]} : vector<4x16xf32> to vector<4x14xf32>
    %10 = tpu.concatenate %8, %9 in 1 : vector<4x2xf32>, vector<4x14xf32> -> vector<4x16xf32>
    %11 = vector.broadcast %7 : vector<4x1xf32> to vector<4x16xf32>
    %12 = arith.mulf %11, %10 : vector<4x16xf32>
    %13 = arith.addf %6, %12 : vector<4x16xf32>
    %14 = vector.extract_strided_slice %4 {offsets = [0, 1], sizes = [4, 1], strides = [1, 1]} : vector<4x3xf32> to vector<4x1xf32>
    %15 = vector.broadcast %14 : vector<4x1xf32> to vector<4x16xf32>
    %16 = arith.mulf %15, %3 : vector<4x16xf32>
    %17 = arith.addf %13, %16 : vector<4x16xf32>
    %18 = vector.extract_strided_slice %4 {offsets = [0, 2], sizes = [4, 1], strides = [1, 1]} : vector<4x3xf32> to vector<4x1xf32>
    %cst_8 = arith.constant 0.000000e+00 : f32
    %19 = vector.broadcast %cst_8 : f32 to vector<4x2xf32>
    %20 = vector.extract_strided_slice %3 {offsets = [0, 2], sizes = [4, 14], strides = [1, 1]} : vector<4x16xf32> to vector<4x14xf32>
    %21 = tpu.concatenate %20, %19 in 1 : vector<4x14xf32>, vector<4x2xf32> -> vector<4x16xf32>
    %22 = vector.broadcast %18 : vector<4x1xf32> to vector<4x16xf32>
    %23 = arith.mulf %22, %21 : vector<4x16xf32>
    %24 = arith.addf %17, %23 : vector<4x16xf32>
    %cst_9 = arith.constant 0.000000e+00 : f32
    %25 = vector.broadcast %cst_9 : f32 to vector<8x16xf32>
    %26 = vector.extract_strided_slice %5 {offsets = [0, 0], sizes = [8, 1], strides = [1, 1]} : vector<8x4xf32> to vector<8x1xf32>
    %27 = vector.extract_strided_slice %24 {offsets = [0, 0], sizes = [1, 16], strides = [1, 1]} : vector<4x16xf32> to vector<1x16xf32>
    %28 = vector.broadcast %26 : vector<8x1xf32> to vector<8x16xf32>
    %29 = vector.broadcast %27 : vector<1x16xf32> to vector<8x16xf32>
    %30 = arith.mulf %28, %29 : vector<8x16xf32>
    %31 = arith.addf %25, %30 : vector<8x16xf32>
    %32 = vector.extract_strided_slice %5 {offsets = [0, 1], sizes = [8, 1], strides = [1, 1]} : vector<8x4xf32> to vector<8x1xf32>
    %33 = vector.extract_strided_slice %24 {offsets = [1, 0], sizes = [1, 16], strides = [1, 1]} : vector<4x16xf32> to vector<1x16xf32>
    %34 = vector.broadcast %32 : vector<8x1xf32> to vector<8x16xf32>
    %35 = vector.broadcast %33 : vector<1x16xf32> to vector<8x16xf32>
    %36 = arith.mulf %34, %35 : vector<8x16xf32>
    %37 = arith.addf %31, %36 : vector<8x16xf32>
    %38 = vector.extract_strided_slice %5 {offsets = [0, 2], sizes = [8, 1], strides = [1, 1]} : vector<8x4xf32> to vector<8x1xf32>
    %39 = vector.extract_strided_slice %24 {offsets = [2, 0], sizes = [1, 16], strides = [1, 1]} : vector<4x16xf32> to vector<1x16xf32>
    %40 = vector.broadcast %38 : vector<8x1xf32> to vector<8x16xf32>
    %41 = vector.broadcast %39 : vector<1x16xf32> to vector<8x16xf32>
    %42 = arith.mulf %40, %41 : vector<8x16xf32>
    %43 = arith.addf %37, %42 : vector<8x16xf32>
    %44 = vector.extract_strided_slice %5 {offsets = [0, 3], sizes = [8, 1], strides = [1, 1]} : vector<8x4xf32> to vector<8x1xf32>
    %45 = vector.extract_strided_slice %24 {offsets = [3, 0], sizes = [1, 16], strides = [1, 1]} : vector<4x16xf32> to vector<1x16xf32>
    %46 = vector.broadcast %44 : vector<8x1xf32> to vector<8x16xf32>
    %47 = vector.broadcast %45 : vector<1x16xf32> to vector<8x16xf32>
    %48 = arith.mulf %46, %47 : vector<8x16xf32>
    %49 = arith.addf %43, %48 : vector<8x16xf32>
    %c0_10 = arith.constant 0 : index
    %c0_11 = arith.constant 0 : index
    %50 = vector.load %arg4[%c0_10, %c0_11] : memref<8x1xf32, #tpu.memory_space<vmem>>, vector<8x1xf32>
    %51 = vector.broadcast %50 : vector<8x1xf32> to vector<8x16xf32>
    %52 = arith.mulf %49, %51 : vector<8x16xf32>
    %c0_12 = arith.constant 0 : index
    %c0_13 = arith.constant 0 : index
    %53 = vector.load %arg5[%c0_12, %c0_13] : memref<8x1xf32, #tpu.memory_space<vmem>>, vector<8x1xf32>
    %54 = vector.broadcast %53 : vector<8x1xf32> to vector<8x16xf32>
    %55 = arith.addf %52, %54 : vector<8x16xf32>
    %c0_14 = arith.constant 0 : index
    %c0_15 = arith.constant 0 : index
    %c0_16 = arith.constant 0 : index
    %56 = vector.load %arg6[%c0_14, %c0_15, %c0_16] : memref<1x8x16xf32, #tpu.memory_space<vmem>>, vector<1x8x16xf32>
    %57 = vector.shape_cast %56 : vector<1x8x16xf32> to vector<8x16xf32>
    %58 = vector.shape_cast %55 : vector<8x16xf32> to vector<1x8x16xf32>
    tpu.vector_store %arg6[%c0_14, %c0_15, %c0_16], %58 {strides = array<i32>} : memref<1x8x16xf32, #tpu.memory_space<vmem>>, vector<1x8x16xf32>,
    return
  }
  func.func @transform_0(%arg0: i32) -> (i32, i32, i32) {
    %c0_i32 = arith.constant 0 : i32
    %c0_i32_0 = arith.constant 0 : i32
    %c0_i32_1 = arith.constant 0 : i32
    return %arg0, %c0_i32, %c0_i32_0 : i32, i32, i32
  }
  func.func @transform_1(%arg0: i32) -> (i32, i32) {
    %c0_i32 = arith.constant 0 : i32
    %c0_i32_0 = arith.constant 0 : i32
    %c0_i32_1 = arith.constant 0 : i32
    return %c0_i32, %c0_i32_0 : i32, i32
  }
  func.func @transform_2(%arg0: i32) -> (i32, i32) {
    %c0_i32 = arith.constant 0 : i32
    %c0_i32_0 = arith.constant 0 : i32
    %c0_i32_1 = arith.constant 0 : i32
    return %c0_i32, %c0_i32_0 : i32, i32
  }
  func.func @transform_3(%arg0: i32) -> (i32, i32) {
    %c0_i32 = arith.constant 0 : i32
    %c0_i32_0 = arith.constant 0 : i32
    %c0_i32_1 = arith.constant 0 : i32
    return %c0_i32, %c0_i32_0 : i32, i32
  }
  func.func @transform_4(%arg0: i32) -> (i32, i32) {
    %c0_i32 = arith.constant 0 : i32
    %c0_i32_0 = arith.constant 0 : i32
    %c0_i32_1 = arith.constant 0 : i32
    return %c0_i32, %c0_i32_0 : i32, i32
  }
  func.func @transform_5(%arg0: i32) -> (i32, i32, i32) {
    %c0_i32 = arith.constant 0 : i32
    %c0_i32_0 = arith.constant 0 : i32
    %c0_i32_1 = arith.constant 0 : i32
    return %arg0, %c0_i32, %c0_i32_0 : i32, i32, i32
  }
}

</mosaic_0001>

<bundles_post_ra>
// kernel: dilconv_forward.2
= control target key start
LH: loop header
LB: loop body
LE: loop exit
PB: predicated region body
PF: predicated region fallthrough
CT: control target
= control target key end

     0   :  { %s445_s15 = smov 0   ;;  %s475_s0 = inlined_call_operand.vmem [shape: f32[2,4,16], index: 0, kind: input, shape index: {}]   ;;  %s476_s1 = inlined_call_operand.vmem [shape: f32[4,3], index: 1, kind: input, shape index: {}]   ;;  %s477_s2 = inlined_call_operand.vmem [shape: f32[8,4], index: 2, kind: input, shape index: {}]   ;;  %s478_s3 = inlined_call_operand.vmem [shape: f32[2,8,1], index: 3, kind: output, shape index: {0}]   ;;  %s479_s4 = inlined_call_operand.vmem [shape: f32[2,8,1], index: 4, kind: output, shape index: {1}]  }
   0x1 LB: > { %s376_s16 = sadd.s32 4294967295, %s412_s15   ;;  %p380_p0 = scmp.ge.s32.totalorder %s412_s15, 1  ;;  %s412_s15 = sphi %s445_s15, %s15_s15  }
   0x2   : > { %p164_p1 = scmp.lt.s32.totalorder %s412_s15, 3 }
   0x4   : > { %p165_p2 = pnand %p380_p0, %p164_p1 }
   0x5   : > { %v206_v0 = vld [vmem:[%s476_s1] sm:$0xf] (!%p165_p2)  ;;  %p192_p3 = scmp.lt.s32.totalorder (!%p165_p2), %s376_s16, 1  ;;  %v414_v1 = vmov (!%p165_p2), 2   ;;  %v415_v2 = vmov (!%p165_p2), 1   ;;  %v416_v3 = vmov (!%p165_p2), 0   ;;  %v243_v10 = vlaneseq (!%p165_p2) }
   0x6   : > { %168 = sbr.rel (%p165_p2) target bundleno = 459 (0x1cb), region = 32  ;;  %402 = vset.pattern.permute.xlu1 (!%p165_p2), %v414_v1  ;;  %400 = vset.pattern.permute.xlu0 (!%p165_p2), %v415_v2  ;;  %v207_v6 = vld [vmem:[%s477_s2] sm:$0xff] (!%p165_p2)  ;;  %s417_s25 = smov (!%p165_p2), 2   ;;  %v419_v7 = vmov (!%p165_p2), 3   ;;  %vm212_vm0 = vcmask (!%p165_p2), 15360   ;;  %vm230_vm1 = vcmask (!%p165_p2), 113664  }
   0x7   : > { %233 = vperm.xlu1 (!%p165_p2), %402, %v206_v0   ;;  %222 = vperm.xlu0 (!%p165_p2), %400, %v206_v0   ;;  %s418_s26 = smov (!%p165_p2), 126   ;;  %v244_v16 = vshrl.u32 (!%p165_p2), %v243_v10, 7  ;;  %vm279_vm2 = vcmask (!%p165_p2), 130048   ;;  %vm289_vm3 = vcmask (!%p165_p2), 7168  }
   0x9   : > { %v245_v21 = vsub.s32 (!%p165_p2), 0, %v244_v16  ;;  %v255_v22 = vsub.s32 (!%p165_p2), 1, %v244_v16  ;;  %v275_v27 = vsub.s32 (!%p165_p2), 3, %v244_v16  ;;  %v265_v29 = vsub.s32 (!%p165_p2), 2, %v244_v16 }
   0xb   : > { %401 = vset.pattern.permute.xlu0 (!%p165_p2), %v416_v3  ;;  %403 = vset.pattern.permute.xlu1 (!%p165_p2), %v415_v2 }
   0xc   : > { %216 = vperm.xlu0 (!%p165_p2), %401, %v206_v0  }
   0xd   : > { %s481_s16 = smov (!%p192_p3, %s376_s16), 1 }
   0xe   : > { %s381_s19 = sshll.u32 %s481_s16, 2  ;;  %s382_s27 = sshll.u32 %s481_s16, 3 }
   0xf   : > { %s195_s22 = scalar_lea.vmem %s475_s0, %s381_s19  ;;  %s199_s30 = scalar_lea.vmem %s478_s3, %s382_s27 }
  0x10   : > { %v204_v4 = vld [vmem:[%s195_s22] sm:$0xf]  ;;  %240 = vperm.xlu0 %401, %v207_v6   ;;  %s203_s7 = scalar_lea.vmem %s479_s4, %s382_s27 }
  0x11   : > { %v205_v5 = vmax.f32 %v204_v4, 0.0 }
  0x13   : > { %209 = vrot.lane.b32.xlu1 %v205_v5, %s417_s25 }
  0x14   : > { %405 = vset.pattern.permute.xlu0 %v419_v7 }
  0x15   : > { %270 = vperm.xlu0 %405, %v207_v6  }
  0x17   : > { %227 = vrot.lane.b32.xlu1 %v205_v5, %s418_s26 }
  0x1b   : > { %250 = vperm.xlu1 %403, %v207_v6  }
  0x1f   : > { %404 = vset.pattern.permute.xlu1 %v414_v1 }
  0x20   : > { %260 = vperm.xlu1 %404, %v207_v6  }
  0x86   : > { %v234_v8 = vpop.permute.xlu1 %233  ;;  %v223_v9 = vpop.permute.xlu0 %222 }
  0x87   : > { %v225_v14 = vmul.f32 %v223_v9, %v205_v5 }
  0x8a   : > { %v210_v11 = vpop.permute.xlu1 %209 }
  0x8b   : > { %v213_v12 = vsel %vm212_vm0, 0.0, %v210_v11  ;;  %v217_v13 = vpop.permute.xlu0 %216 }
  0x8c   : > { %v219_v15 = vmul.f32 %v217_v13, %v213_v12 }
  0x8e   : > { %v228_v17 = vpop.permute.xlu1 %227  ;;  %v226_v19 = vadd.f32 %v225_v14, %v219_v15 }
  0x8f   : > { %v231_v18 = vsel %vm230_vm1, %v228_v17, 0.0  ;;  %v241_v24 = vpop.permute.xlu0 %240 }
  0x90   : > { %v236_v20 = vmul.f32 %v234_v8, %v231_v18 }
  0x92   : > { %v237_v23 = vadd.f32 %v236_v20, %v226_v19 }
  0x94   : > { %v246_v25 = vrot.slane %v237_v23, %v245_v21  ;;  %v256_v26 = vrot.slane %v237_v23, %v255_v22  ;;  %v276_v32 = vrot.slane %v237_v23, %v275_v27  ;;  %v266_v33 = vrot.slane %v237_v23, %v265_v29  ;;  %v271_v34 = vpop.permute.xlu0 %270 }
  0x96   : > { %v247_v30 = vmul.f32 %v246_v25, %v241_v24  ;;  %v277_v38 = vmul.f32 %v276_v32, %v271_v34 }
  0x9a   : > { %v251_v28 = vpop.permute.xlu1 %250 }
  0x9b   : > { %v257_v31 = vmul.f32 %v256_v26, %v251_v28 }
  0x9d   : > { %v258_v36 = vadd.f32 %v257_v31, %v247_v30 }
  0x9f   : > { %v261_v35 = vpop.permute.xlu1 %260 }
  0xa0   : > { %v267_v37 = vmul.f32 %v266_v33, %v261_v35 }
  0xa2   : > { %v268_v39 = vadd.f32 %v267_v37, %v258_v36 }
  0xa4   : > { %v278_v40 = vadd.f32 %v277_v38, %v268_v39 }
  0xa6   : > { %v280_v41 = vsel %vm279_vm2, %v278_v40, 0.0 }
  0xa7   : > { %281 = vadd.xlane.f32.xlu1 %v280_v41 }
 0x134   : > { %v282_v42 = vpop.xlane.xlu1 %281 }
 0x135   : > { %v283_v43 = vmul.f32 0.0625, %v282_v42 }
 0x137   : > { %v284_v44 = vsub.f32 %v278_v40, %v283_v43  ;;  %290 = vst.msk [vmem:[%s199_s30] sm:$0xff] %vm289_vm3, %v283_v43 }
 0x139   : > { %v285_v45 = vmul.f32 %v284_v44, %v284_v44 }
 0x13b   : > { %v286_v46 = vsel %vm279_vm2, %v285_v45, 0.0 }
 0x13c   : > { %287 = vadd.xlane.f32.xlu0 %v286_v46 }
 0x1c9   : > { %v288_v47 = vpop.xlane.xlu0 %287 }
 0x1ca   : > { %291 = vst.msk [vmem:[%s203_s7] sm:$0xff] %vm289_vm3, %v288_v47 }
 0x1cb PF: > { %s15_s15 = sadd.s32 1, %s412_s15  }
 0x1cc   : > { %p12_p4 = scmp.ge.s32.totalorder %s15_s15, 4  }
 0x1ce   :  { %14 = sbr.rel (!%p12_p4) target bundleno = 1 (0x1), region = 74 }

// kernel: dilconv_forward.3
= control target key start
LH: loop header
LB: loop body
LE: loop exit
PB: predicated region body
PF: predicated region fallthrough
CT: control target
= control target key end

     0   :  { %10 = vsyncpa [#allocation3], 0  ;;  %s660_s0 = inlined_call_operand.vmem [shape: f32[2,4,16], index: 0, kind: input, shape index: {}]   ;;  %s661_s1 = inlined_call_operand.vmem [shape: f32[4,3], index: 1, kind: input, shape index: {}]   ;;  %s662_s2 = inlined_call_operand.vmem [shape: f32[8,4], index: 2, kind: input, shape index: {}]   ;;  %s663_s3 = inlined_call_operand.vmem [shape: f32[8,1], index: 3, kind: input, shape index: {}]   ;;  %s664_s4 = inlined_call_operand.vmem [shape: f32[8,1], index: 4, kind: input, shape index: {}]   ;;  %s665_s5 = inlined_call_operand.hbm [shape: f32[2,8,16], index: 5, kind: output, shape index: {}]  }
   0x1   :  { %12 = vsyncpa [#allocation3 + $0x1], 0  ;;  %s548_s18 = smov 0   ;;  %s550_s19 = smov 0  }
   0x2   :  { %s552_s20 = smov 0   ;;  %s554_s21 = smov 0  }
   0x3 LB: > { %s569_s22 = sadd.s32 4294967295, %s509_s21   ;;  %s384_s23 = sadd.s32 4294967294, %s509_s21   ;;  %s509_s21 = sphi %s554_s21, %s671_s21   ;;  %s505_s20 = sphi %s552_s20, %s670_s20   ;;  %s501_s19 = sphi %s550_s19, %s669_s19   ;;  %s497_s18 = sphi %s548_s18, %s668_s18  }
   0x4   : > { %s573_s24 = sadd.s32 1, %s509_s21   ;;  %s135_s25 = sadd.s32 1, %s505_s20 }
   0x5   : > { %s132_s26 = ssub.s32 %s509_s21, %s573_s24  ;;  %p145_p0 = scmp.ne.s32.totalorder %s505_s20, %s501_s19 }
   0x6   : > { %p133_p1 = scmp.eq.s32.totalorder %s132_s26, 0  ;;  %p146_p2 = scmp.eq.s32.totalorder %s569_s22, 1 }
   0x7   : > { %p151_p3 = scmp.ne.s32.totalorder %s501_s19, %s497_s18  ;;  %p152_p4 = scmp.eq.s32.totalorder %s384_s23, 1 }
   0x8   : > { %s584_s27 = scalar_select %p133_p1, %s505_s20, %s135_s25  }
   0x9   : > { %p586_p5 = por %p146_p2, %p145_p0  ;;  %p590_p6 = por %p152_p4, %p151_p3 }
   0xa   : > { %p387_p7 = scmp.ge.s32.totalorder %s509_s21, 1  ;;  %p189_p8 = scmp.lt.s32.totalorder %s509_s21, 3 }
   0xc   : > { %p190_p9 = pnand %p387_p7, %p189_p8 }
   0xd   : > { %v222_v0 = vld [vmem:[%s661_s1] sm:$0xf] (!%p190_p9)  ;;  %p216_p10 = scmp.lt.s32.totalorder (!%p190_p9), %s569_s22, 1  ;;  %v511_v1 = vmov (!%p190_p9), 2   ;;  %v512_v2 = vmov (!%p190_p9), 1   ;;  %v513_v3 = vmov (!%p190_p9), 0   ;;  %v259_v12 = vlaneseq (!%p190_p9) }
   0xe   : > { %193 = sbr.rel (%p190_p9) target bundleno = 194 (0xc2), region = 40  ;;  %441 = vset.pattern.permute.xlu1 (!%p190_p9), %v511_v1  ;;  %439 = vset.pattern.permute.xlu0 (!%p190_p9), %v512_v2  ;;  %v223_v6 = vld [vmem:[%s662_s2] sm:$0xff] (!%p190_p9)  ;;  %s514_s14 = smov (!%p190_p9), 2   ;;  %v516_v7 = vmov (!%p190_p9), 3   ;;  %vm228_vm0 = vcmask (!%p190_p9), 15360   ;;  %vm246_vm1 = vcmask (!%p190_p9), 113664  }
   0xf   : > { %249 = vperm.xlu1 (!%p190_p9), %441, %v222_v0   ;;  %238 = vperm.xlu0 (!%p190_p9), %439, %v222_v0   ;;  %s515_s15 = smov (!%p190_p9), 126   ;;  %v295_v8 = vld [vmem:[%s663_s3] sm:$0xff] (!%p190_p9)  ;;  %v260_v18 = vshrl.u32 (!%p190_p9), %v259_v12, 7  ;;  %s213_s26 = sand.u32 (!%p190_p9), 1, %s501_s19   ;;  %vm309_vm2 = vcmask (!%p190_p9), 130048  }
  0x10   : > { %v302_v9 = vld [vmem:[%s664_s4] sm:$0xff] (!%p190_p9)  ;;  %s388_s30 = sshll.u32 (!%p190_p9), %s213_s26, 3  ;;  %s391_s6 = sshll.u32 (!%p190_p9), %s569_s22, 7 }
  0x11   : > { %v261_v23 = vsub.s32 (!%p190_p9), 0, %v260_v18  ;;  %v271_v24 = vsub.s32 (!%p190_p9), 1, %v260_v18  ;;  %v291_v29 = vsub.s32 (!%p190_p9), 3, %v260_v18  ;;  %v281_v31 = vsub.s32 (!%p190_p9), 2, %v260_v18  ;;  %s312_s12 = scalar_lea.sflag (!%p190_p9), [#allocation3], %s213_s26 }
  0x13   : > { %440 = vset.pattern.permute.xlu0 (!%p190_p9), %v513_v3  ;;  %442 = vset.pattern.permute.xlu1 (!%p190_p9), %v512_v2 }
  0x14   : > { %232 = vperm.xlu0 (!%p190_p9), %440, %v222_v0  }
  0x15   : > { %s217_s7 = scalar_select %p216_p10, %s569_s22, 1 }
  0x16   : > { %s517_s22 = smov [#allocation2]  }
  0x17   : > { %s389_s8 = sshll.u32 %s217_s7, 2  ;;  %s215_s7 = scalar_lea.vmem [#allocation2], %s388_s30 }
  0x18   : > { %s219_s11 = scalar_lea.vmem %s660_s0, %s389_s8  ;;  %256 = vperm.xlu0 %440, %v223_v6   ;;  %s325_s8 = sshll.u32 %s215_s7, 4  ;;  %s620_s8 = int_to_ptr.vmem [resolvable:$true] %s325_s8 }
  0x19   : > { %v220_v4 = vld [vmem:[%s219_s11] sm:$0xf]  ;;  %s618_s11 = scalar_lea.hbm %s665_s5, %s391_s6  ;;  %s447_s13 = scalar_lea.vmem %s620_s8, 128 }
  0x1a   : > { %v221_v5 = vmax.f32 %v220_v4, 0.0  ;;  %p448_p11 = scmp.ne.s32.totalorder %s620_s8, %s447_s13 }
  0x1c   : > { %225 = vrot.lane.b32.xlu1 %v221_v5, %s514_s14  ;;  %444 = vset.pattern.permute.xlu0 %v516_v7  ;;  %p449_p12 = pnand %p448_p11, %p586_p5  ;;  %s451_s14 = sshll.u32 %s517_s22, 4  ;;  %s452_s14 = int_to_ptr.vmem [resolvable:$false] %s451_s14 }
  0x1d   : > { %286 = vperm.xlu0 %444, %v223_v6   ;;  %p454_p0 = scmp.lt.s32.totalorder %s620_s8, %s452_s14 }
  0x1e   : > { %p450_p13 = pneg %p449_p12 }
  0x20   : > { %243 = vrot.lane.b32.xlu1 %v221_v5, %s515_s15  ;;  %s453_s15 = scalar_lea.vmem %s452_s14, 256 }
  0x21   : > { %446 = vset.pattern.permute.xlu0 %v513_v3  ;;  %p455_p1 = scmp.lt.s32.totalorder %s453_s15, %s447_s13 }
  0x23   : > { %p456_p2 = por %p455_p1, %p454_p0 }
  0x24   : > { %266 = vperm.xlu1 %442, %v223_v6  }
  0x25   : > { %p457_p3 = pnand %p456_p2, %p450_p13 }
  0x28   : > { %443 = vset.pattern.permute.xlu1 %v511_v1 }
  0x29   : > { %276 = vperm.xlu1 %443, %v223_v6  }
  0x2d   : > { %445 = vset.pattern.permute.xlu1 %v513_v3 }
  0x2e   : > { %298 = vperm.xlu1 %445, %v295_v8  }
  0x32   : > { %305 = vperm.xlu1 %445, %v302_v9  }
  0x8e   : > { %v250_v10 = vpop.permute.xlu1 %249  ;;  %v239_v11 = vpop.permute.xlu0 %238 }
  0x8f   : > { %v241_v16 = vmul.f32 %v239_v11, %v221_v5 }
  0x92   : > { %v226_v13 = vpop.permute.xlu1 %225 }
  0x93   : > { %v229_v14 = vsel %vm228_vm0, 0.0, %v226_v13  ;;  %v233_v15 = vpop.permute.xlu0 %232 }
  0x94   : > { %v235_v17 = vmul.f32 %v233_v15, %v229_v14 }
  0x96   : > { %v244_v19 = vpop.permute.xlu1 %243  ;;  %v242_v21 = vadd.f32 %v241_v16, %v235_v17 }
  0x97   : > { %v247_v20 = vsel %vm246_vm1, %v244_v19, 0.0  ;;  %v257_v26 = vpop.permute.xlu0 %256 }
  0x98   : > { %v252_v22 = vmul.f32 %v250_v10, %v247_v20 }
  0x9a   : > { %v253_v25 = vadd.f32 %v252_v22, %v242_v21 }
  0x9c   : > { %v262_v27 = vrot.slane %v253_v25, %v261_v23  ;;  %v272_v28 = vrot.slane %v253_v25, %v271_v24  ;;  %v292_v34 = vrot.slane %v253_v25, %v291_v29  ;;  %v282_v35 = vrot.slane %v253_v25, %v281_v31  ;;  %v287_v36 = vpop.permute.xlu0 %286 }
  0x9e   : > { %v263_v32 = vmul.f32 %v262_v27, %v257_v26  ;;  %v293_v40 = vmul.f32 %v292_v34, %v287_v36 }
  0xa3   : > { %v267_v30 = vpop.permute.xlu1 %266 }
  0xa4   : > { %v273_v33 = vmul.f32 %v272_v28, %v267_v30 }
  0xa6   : > { %v274_v38 = vadd.f32 %v273_v33, %v263_v32 }
  0xa8   : > { %v277_v37 = vpop.permute.xlu1 %276 }
  0xa9   : > { %v283_v39 = vmul.f32 %v282_v35, %v277_v37 }
  0xab   : > { %v284_v41 = vadd.f32 %v283_v39, %v274_v38 }
  0xad   : > { %v299_v42 = vpop.permute.xlu1 %298  ;;  %v294_v43 = vadd.f32 %v293_v40, %v284_v41 }
  0xaf   : > { %v301_v44 = vmul.f32 %v299_v42, %v294_v43 }
  0xb1   : > { %v306_v45 = vpop.permute.xlu1 %305 }
  0xb2   : > { %v308_v46 = vadd.f32 %v306_v45, %v301_v44 }
  0xb4   : > { %310 = vst.msk [vmem:[%s215_s7] sm:$0xff] %vm309_vm2, %v308_v46 }
  0xb5   : > { %460 = shalt.err (!%p457_p3)
}
  0xb6   : > { %s461_s16 = scalar_lea.hbm %s618_s11, 128  ;;  %s465_s25 = scalar_lea.hbm %s665_s5, 256 }
  0xb7   : > { %p462_p4 = scmp.ne.s32.totalorder %s618_s11, %s461_s16  ;;  %p466_p9 = scmp.lt.u32.totalorder %s618_s11, %s665_s5 }
  0xb8   : > { %p467_p10 = scmp.lt.u32.totalorder %s465_s25, %s461_s16  ;;  %p469_p12 = scmp.lt.u32.totalorder %s461_s16, %s618_s11 }
  0xb9   : > { %p463_p7 = pnand %p462_p4, %p586_p5 }
  0xba   : > { %p468_p11 = por %p467_p10, %p466_p9 }
  0xbb   : > { %p464_p8 = pneg %p463_p7 }
  0xbc   : > { %p470_p13 = por %p469_p12, %p468_p11 }
  0xbe   : > { %p471_p0 = pnand %p470_p13, %p464_p8 }
  0xc0   : > { %474 = shalt.err (!%p471_p0)
}
  0xc1   : > { %394 = dma.vmem_to_hbm [thread:$0]  (%p586_p5), %s620_s8, 128, %s618_s11, %s312_s12  }
  0xc2 PF: > { %p400_p1 = scmp.ge.s32.totalorder %s509_s21, 2  ;;  %s337_s6 = sand.u32 1, %s497_s18  }
  0xc3   : > { %s338_s7 = scalar_lea.sflag [#allocation3], %s337_s6 }
  0xc4   : > { %p397_p2 = pnand %p400_p1, %p590_p6 }
  0xc6   : > { %492 = dma.done.wait (!%p397_p2), %s338_s7, 128  }
  0xc7   : > { %494 = vsyncadd (!%p397_p2), %s338_s7, 4294967168  ;;  %p15_p3 = scmp.ge.s32.totalorder %s573_s24, 4   ;;  %s668_s18 = smov %s501_s19 }
  0xc8   : > { %s669_s19 = smov %s505_s20  ;;  %s670_s20 = smov %s584_s27 }
  0xc9   : > { %s671_s21 = smov %s573_s24  ;;  %17 = sbr.rel (!%p15_p3) target bundleno = 3 (0x3), region = 75 }
  0xd0   :  { %343 = vsyncpa [#allocation3], 1 }
  0xd1   :  { %345 = vsyncpa [#allocation3 + $0x1], 1 }

</bundles_post_ra>
